<compile_context>
chip_gen: v7x
topology: tpu7x:2x2x1
jax: 0.10.0
libtpu: 0.0.40
codegen_flags: <defaults>
</compile_context>

<pallas_src>
import functools

import jax
import jax.numpy as jnp
from jax.experimental import pallas as pl
from jax.experimental.pallas import tpu as pltpu

LANE = 128
SUBLANE = 8
MAX_TILE_B = 128  # MXU-friendly batch tile for large batches.


def _round_up(x, m):
    return ((x + m - 1) // m) * m


def dqn_kernel(x_ref,
               w1_ref, b1_ref,
               w2_ref, b2_ref,
               w3_ref, b3_ref,
               w4_ref, b4_ref,
               w5_ref, b5_ref,
               out_ref):
    """Fused 5-layer MLP: relu(x@W1+b1) -> ... -> x@W5+b5 (bf16 MXU, f32 acc)."""

    def layer(h_bf16, w_ref, b_ref, relu):
        # bf16 x bf16 -> f32 accumulation on the MXU; bias/ReLU in f32 (VPU).
        acc = jnp.dot(h_bf16, w_ref[...], preferred_element_type=jnp.float32)
        acc = acc + b_ref[...]
        if relu:
            acc = jnp.maximum(acc, 0.0)
        return acc

    h = x_ref[...].astype(jnp.bfloat16)
    h = layer(h, w1_ref, b1_ref, True).astype(jnp.bfloat16)
    h = layer(h, w2_ref, b2_ref, True).astype(jnp.bfloat16)
    h = layer(h, w3_ref, b3_ref, True).astype(jnp.bfloat16)
    h = layer(h, w4_ref, b4_ref, True).astype(jnp.bfloat16)
    out = layer(h, w5_ref, b5_ref, False)
    out_ref[...] = out.astype(out_ref.dtype)


@functools.partial(jax.jit, static_argnums=2)
def dqn_forward(x, params, output_size):
    """x: [B, input_size] f32. params: list of (W_T bf16 [in,out], b f32 [1,out]).

    The last layer's W/b are already lane-padded to a multiple of 128; the
    result is sliced back to [:, :output_size] here.
    """
    B, in_size = x.shape
    n_pad = params[-1][0].shape[1]  # lane-padded final width (multiple of 128)

    # Adaptive batch tiling: tiny DQN batches use one sublane-aligned tile
    # (no wasteful padding to 128 rows); big batches tile at MAX_TILE_B.
    tile_b = min(MAX_TILE_B, _round_up(B, SUBLANE))
    B_pad = _round_up(B, tile_b)
    if B_pad != B:
        x = jnp.pad(x, ((0, B_pad - B), (0, 0)))

    flat_args = [x]
    for w, b in params:
        flat_args.extend((w, b))

    # x/out stream one batch tile per grid step; weights/biases use a constant
    # block index so they are DMA'd once and stay VMEM-resident across steps.
    def const_spec(shape):
        return pl.BlockSpec(shape, lambda i: (0, 0))

    in_specs = [pl.BlockSpec((tile_b, in_size), lambda i: (i, 0))]
    for w, b in params:
        in_specs.append(const_spec(w.shape))
        in_specs.append(const_spec(b.shape))
    out_spec = pl.BlockSpec((tile_b, n_pad), lambda i: (i, 0))

    # Advisory cost estimate so XLA can schedule/overlap this small call.
    dims = [in_size] + [w.shape[1] for w, _ in params]
    flops = 2 * B_pad * sum(dims[i] * dims[i + 1] for i in range(len(params)))
    bytes_accessed = (sum(int(a.size) * a.dtype.itemsize for a in flat_args)
                      + B_pad * n_pad * 4)
    cost = pl.CostEstimate(flops=flops, transcendentals=0,
                           bytes_accessed=bytes_accessed)

    out = pl.pallas_call(
        dqn_kernel,
        out_shape=jax.ShapeDtypeStruct((B_pad, n_pad), jnp.float32),
        grid=(B_pad // tile_b,),
        in_specs=in_specs,
        out_specs=out_spec,
        compiler_params=pltpu.CompilerParams(
            dimension_semantics=("parallel",),
            vmem_limit_bytes=32 * 1024 * 1024),
        cost_estimate=cost,
    )(*flat_args)

    return out[:B, :output_size]


def init_dqn_params(key, input_size, output_size):
    """PyTorch-Linear-style init; W stored transposed [in,out] in bf16, b in f32.

    The last layer is zero-padded along its output dim to a multiple of 128 so
    the kernel's output store is lane-dense.
    """
    dims = [input_size, 256, 512, 256, 128, output_size]
    params = []
    for i in range(5):
        fan_in, fan_out = dims[i], dims[i + 1]
        key, kw, kb = jax.random.split(key, 3)
        bound = 1.0 / jnp.sqrt(jnp.float32(fan_in))
        w_t = jax.random.uniform(kw, (fan_in, fan_out), jnp.float32,
                                 minval=-bound, maxval=bound)
        b = jax.random.uniform(kb, (1, fan_out), jnp.float32,
                               minval=-bound, maxval=bound)
        if i == 4:
            n_pad = _round_up(fan_out, LANE)
            w_t = jnp.pad(w_t, ((0, 0), (0, n_pad - fan_out)))
            b = jnp.pad(b, ((0, 0), (0, n_pad - fan_out)))
        params.append((w_t.astype(jnp.bfloat16), b))
    return params


def dqn_reference_bf16(x, params):
    """Plain-JAX reference mirroring the kernel numerics (bf16 ops, f32 acc)."""
    h = x
    for i, (w, b) in enumerate(params):
        h = jnp.dot(h.astype(jnp.bfloat16), w,
                    preferred_element_type=jnp.float32) + b
        if i < len(params) - 1:
            h = jnp.maximum(h, 0.0)
    return h


def dqn_reference_f32(x, params):
    """Full-precision reference matching the original PyTorch forward."""
    h = x
    for i, (w, b) in enumerate(params):
        h = jnp.dot(h, w.astype(jnp.float32),
                    precision=jax.lax.Precision.HIGHEST) + b
        if i < len(params) - 1:
            h = jnp.maximum(h, 0.0)
    return h


if __name__ == "__main__":
    key = jax.random.PRNGKey(0)
    input_size = 16   # e.g. flattened state vector
    output_size = 4   # number of discrete actions
    batch = 8

    key, kx = jax.random.split(key)
    x = jax.random.normal(kx, (batch, input_size), jnp.float32)
    params = init_dqn_params(key, input_size, output_size)

    # Small-batch path (single sublane-aligned tile, no 128-row padding).
    out = jax.block_until_ready(dqn_forward(x, params, output_size))
    assert out.shape == (batch, output_size)

    ref_bf16 = dqn_reference_bf16(x, params)[:, :output_size]
    assert jnp.allclose(out, ref_bf16, atol=1e-2, rtol=1e-2), "mismatch vs bf16 reference"

    ref_f32 = dqn_reference_f32(x, params)[:, :output_size]
    assert jnp.allclose(out, ref_f32, atol=5e-2, rtol=5e-2), "mismatch vs f32 reference"

    # Multi-tile grid path (batch > MAX_TILE_B) exercising VMEM-resident weights.
    key, kx2 = jax.random.split(key)
    x_big = jax.random.normal(kx2, (300, input_size), jnp.float32)
    out_big = jax.block_until_ready(dqn_forward(x_big, params, output_size))
    ref_big = dqn_reference_bf16(x_big, params)[:, :output_size]
    assert out_big.shape == (300, output_size)
    assert jnp.allclose(out_big, ref_big, atol=1e-2, rtol=1e-2), "mismatch (multi-tile)"

    print("KERNEL_OK")
</pallas_src>

<mosaic_0001>
module attributes {stable_mosaic.version = 11 : i64} {
  func.func @dqn_kernel(%arg0: i32, %arg1: memref<8x16xf32, #tpu.memory_space<vmem>>, %arg2: memref<16x256xbf16, #tpu.memory_space<vmem>>, %arg3: memref<1x256xf32, #tpu.memory_space<vmem>>, %arg4: memref<256x512xbf16, #tpu.memory_space<vmem>>, %arg5: memref<1x512xf32, #tpu.memory_space<vmem>>, %arg6: memref<512x256xbf16, #tpu.memory_space<vmem>>, %arg7: memref<1x256xf32, #tpu.memory_space<vmem>>, %arg8: memref<256x128xbf16, #tpu.memory_space<vmem>>, %arg9: memref<1x128xf32, #tpu.memory_space<vmem>>, %arg10: memref<128x128xbf16, #tpu.memory_space<vmem>>, %arg11: memref<1x128xf32, #tpu.memory_space<vmem>>, %arg12: memref<8x128xf32, #tpu.memory_space<vmem>>) attributes {dimension_semantics = [#tpu.dimension_semantics<parallel>], iteration_bounds = array<i64: 1>, scalar_prefetch = 0 : i64, scratch_operands = 0 : i64, tpu.core_type = #tpu.core_type<tc>, window_params = [{transform_indices = @transform_0, window_bounds = array<i64: 8, 16>}, {pipeline_mode = #tpu.pipeline_mode<synchronous>, transform_indices = @transform_1, window_bounds = array<i64: 16, 256>}, {pipeline_mode = #tpu.pipeline_mode<synchronous>, transform_indices = @transform_2, window_bounds = array<i64: 1, 256>}, {pipeline_mode = #tpu.pipeline_mode<synchronous>, transform_indices = @transform_3, window_bounds = array<i64: 256, 512>}, {pipeline_mode = #tpu.pipeline_mode<synchronous>, transform_indices = @transform_4, window_bounds = array<i64: 1, 512>}, {pipeline_mode = #tpu.pipeline_mode<synchronous>, transform_indices = @transform_5, window_bounds = array<i64: 512, 256>}, {pipeline_mode = #tpu.pipeline_mode<synchronous>, transform_indices = @transform_6, window_bounds = array<i64: 1, 256>}, {pipeline_mode = #tpu.pipeline_mode<synchronous>, transform_indices = @transform_7, window_bounds = array<i64: 256, 128>}, {pipeline_mode = #tpu.pipeline_mode<synchronous>, transform_indices = @transform_8, window_bounds = array<i64: 1, 128>}, {pipeline_mode = #tpu.pipeline_mode<synchronous>, transform_indices = @transform_9, window_bounds = array<i64: 128, 128>}, {pipeline_mode = #tpu.pipeline_mode<synchronous>, transform_indices = @transform_10, window_bounds = array<i64: 1, 128>}, {transform_indices = @transform_11, window_bounds = array<i64: 8, 128>}]} {
    %c0 = arith.constant 0 : index
    %c0_0 = arith.constant 0 : index
    %0 = vector.load %arg1[%c0, %c0_0] : memref<8x16xf32, #tpu.memory_space<vmem>>, vector<8x16xf32>
    %1 = arith.truncf %0 : vector<8x16xf32> to vector<8x16xbf16>
    %c0_1 = arith.constant 0 : index
    %c0_2 = arith.constant 0 : index
    %2 = vector.load %arg2[%c0_1, %c0_2] : memref<16x256xbf16, #tpu.memory_space<vmem>>, vector<16x256xbf16>
    %cst = arith.constant dense<0.000000e+00> : vector<8x256xf32>
    %3 = tpu.matmul %1, %2, %cst {dimension_numbers = #tpu.dot_dimension_numbers<[1], [0], [0], [1], [0, 0, 1, 1], [], []>} : vector<8x16xbf16>, vector<16x256xbf16>, vector<8x256xf32> -> vector<8x256xf32>
    %c0_3 = arith.constant 0 : index
    %c0_4 = arith.constant 0 : index
    %4 = vector.load %arg3[%c0_3, %c0_4] : memref<1x256xf32, #tpu.memory_space<vmem>>, vector<1x256xf32>
    %5 = vector.broadcast %4 : vector<1x256xf32> to vector<8x256xf32>
    %6 = arith.addf %3, %5 : vector<8x256xf32>
    %cst_5 = arith.constant 0.000000e+00 : f32
    %7 = vector.broadcast %cst_5 : f32 to vector<8x256xf32>
    %8 = arith.maximumf %6, %7 : vector<8x256xf32>
    %9 = arith.truncf %8 : vector<8x256xf32> to vector<8x256xbf16>
    %c0_6 = arith.constant 0 : index
    %c0_7 = arith.constant 0 : index
    %10 = vector.load %arg4[%c0_6, %c0_7] : memref<256x512xbf16, #tpu.memory_space<vmem>>, vector<256x512xbf16>
    %cst_8 = arith.constant dense<0.000000e+00> : vector<8x512xf32>
    %11 = tpu.matmul %9, %10, %cst_8 {dimension_numbers = #tpu.dot_dimension_numbers<[1], [0], [0], [1], [0, 0, 1, 1], [], []>} : vector<8x256xbf16>, vector<256x512xbf16>, vector<8x512xf32> -> vector<8x512xf32>
    %c0_9 = arith.constant 0 : index
    %c0_10 = arith.constant 0 : index
    %12 = vector.load %arg5[%c0_9, %c0_10] : memref<1x512xf32, #tpu.memory_space<vmem>>, vector<1x512xf32>
    %13 = vector.broadcast %12 : vector<1x512xf32> to vector<8x512xf32>
    %14 = arith.addf %11, %13 : vector<8x512xf32>
    %cst_11 = arith.constant 0.000000e+00 : f32
    %15 = vector.broadcast %cst_11 : f32 to vector<8x512xf32>
    %16 = arith.maximumf %14, %15 : vector<8x512xf32>
    %17 = arith.truncf %16 : vector<8x512xf32> to vector<8x512xbf16>
    %c0_12 = arith.constant 0 : index
    %c0_13 = arith.constant 0 : index
    %18 = vector.load %arg6[%c0_12, %c0_13] : memref<512x256xbf16, #tpu.memory_space<vmem>>, vector<512x256xbf16>
    %cst_14 = arith.constant dense<0.000000e+00> : vector<8x256xf32>
    %19 = tpu.matmul %17, %18, %cst_14 {dimension_numbers = #tpu.dot_dimension_numbers<[1], [0], [0], [1], [0, 0, 1, 1], [], []>} : vector<8x512xbf16>, vector<512x256xbf16>, vector<8x256xf32> -> vector<8x256xf32>
    %c0_15 = arith.constant 0 : index
    %c0_16 = arith.constant 0 : index
    %20 = vector.load %arg7[%c0_15, %c0_16] : memref<1x256xf32, #tpu.memory_space<vmem>>, vector<1x256xf32>
    %21 = vector.broadcast %20 : vector<1x256xf32> to vector<8x256xf32>
    %22 = arith.addf %19, %21 : vector<8x256xf32>
    %cst_17 = arith.constant 0.000000e+00 : f32
    %23 = vector.broadcast %cst_17 : f32 to vector<8x256xf32>
    %24 = arith.maximumf %22, %23 : vector<8x256xf32>
    %25 = arith.truncf %24 : vector<8x256xf32> to vector<8x256xbf16>
    %c0_18 = arith.constant 0 : index
    %c0_19 = arith.constant 0 : index
    %26 = vector.load %arg8[%c0_18, %c0_19] : memref<256x128xbf16, #tpu.memory_space<vmem>>, vector<256x128xbf16>
    %cst_20 = arith.constant dense<0.000000e+00> : vector<8x128xf32>
    %27 = tpu.matmul %25, %26, %cst_20 {dimension_numbers = #tpu.dot_dimension_numbers<[1], [0], [0], [1], [0, 0, 1, 1], [], []>} : vector<8x256xbf16>, vector<256x128xbf16>, vector<8x128xf32> -> vector<8x128xf32>
    %c0_21 = arith.constant 0 : index
    %c0_22 = arith.constant 0 : index
    %28 = vector.load %arg9[%c0_21, %c0_22] : memref<1x128xf32, #tpu.memory_space<vmem>>, vector<1x128xf32>
    %29 = vector.broadcast %28 : vector<1x128xf32> to vector<8x128xf32>
    %30 = arith.addf %27, %29 : vector<8x128xf32>
    %cst_23 = arith.constant 0.000000e+00 : f32
    %31 = vector.broadcast %cst_23 : f32 to vector<8x128xf32>
    %32 = arith.maximumf %30, %31 : vector<8x128xf32>
    %33 = arith.truncf %32 : vector<8x128xf32> to vector<8x128xbf16>
    %c0_24 = arith.constant 0 : index
    %c0_25 = arith.constant 0 : index
    %34 = vector.load %arg10[%c0_24, %c0_25] : memref<128x128xbf16, #tpu.memory_space<vmem>>, vector<128x128xbf16>
    %cst_26 = arith.constant dense<0.000000e+00> : vector<8x128xf32>
    %35 = tpu.matmul %33, %34, %cst_26 {dimension_numbers = #tpu.dot_dimension_numbers<[1], [0], [0], [1], [0, 0, 1, 1], [], []>} : vector<8x128xbf16>, vector<128x128xbf16>, vector<8x128xf32> -> vector<8x128xf32>
    %c0_27 = arith.constant 0 : index
    %c0_28 = arith.constant 0 : index
    %36 = vector.load %arg11[%c0_27, %c0_28] : memref<1x128xf32, #tpu.memory_space<vmem>>, vector<1x128xf32>
    %37 = vector.broadcast %36 : vector<1x128xf32> to vector<8x128xf32>
    %38 = arith.addf %35, %37 : vector<8x128xf32>
    %c0_29 = arith.constant 0 : index
    %c0_30 = arith.constant 0 : index
    %39 = vector.load %arg12[%c0_29, %c0_30] : memref<8x128xf32, #tpu.memory_space<vmem>>, vector<8x128xf32>
    tpu.vector_store %arg12[%c0_29, %c0_30], %38 {strides = array<i32>} : memref<8x128xf32, #tpu.memory_space<vmem>>, vector<8x128xf32>,
    return
  }
  func.func @transform_0(%arg0: i32) -> (i32, i32) {
    %c0_i32 = arith.constant 0 : i32
    %c0_i32_0 = arith.constant 0 : i32
    return %arg0, %c0_i32 : i32, i32
  }
  func.func @transform_1(%arg0: i32) -> (i32, i32) {
    %c0_i32 = arith.constant 0 : i32
    %c0_i32_0 = arith.constant 0 : i32
    %c0_i32_1 = arith.constant 0 : i32
    return %c0_i32, %c0_i32_0 : i32, i32
  }
  func.func @transform_2(%arg0: i32) -> (i32, i32) {
    %c0_i32 = arith.constant 0 : i32
    %c0_i32_0 = arith.constant 0 : i32
    %c0_i32_1 = arith.constant 0 : i32
    return %c0_i32, %c0_i32_0 : i32, i32
  }
  func.func @transform_3(%arg0: i32) -> (i32, i32) {
    %c0_i32 = arith.constant 0 : i32
    %c0_i32_0 = arith.constant 0 : i32
    %c0_i32_1 = arith.constant 0 : i32
    return %c0_i32, %c0_i32_0 : i32, i32
  }
  func.func @transform_4(%arg0: i32) -> (i32, i32) {
    %c0_i32 = arith.constant 0 : i32
    %c0_i32_0 = arith.constant 0 : i32
    %c0_i32_1 = arith.constant 0 : i32
    return %c0_i32, %c0_i32_0 : i32, i32
  }
  func.func @transform_5(%arg0: i32) -> (i32, i32) {
    %c0_i32 = arith.constant 0 : i32
    %c0_i32_0 = arith.constant 0 : i32
    %c0_i32_1 = arith.constant 0 : i32
    return %c0_i32, %c0_i32_0 : i32, i32
  }
  func.func @transform_6(%arg0: i32) -> (i32, i32) {
    %c0_i32 = arith.constant 0 : i32
    %c0_i32_0 = arith.constant 0 : i32
    %c0_i32_1 = arith.constant 0 : i32
    return %c0_i32, %c0_i32_0 : i32, i32
  }
  func.func @transform_7(%arg0: i32) -> (i32, i32) {
    %c0_i32 = arith.constant 0 : i32
    %c0_i32_0 = arith.constant 0 : i32
    %c0_i32_1 = arith.constant 0 : i32
    return %c0_i32, %c0_i32_0 : i32, i32
  }
  func.func @transform_8(%arg0: i32) -> (i32, i32) {
    %c0_i32 = arith.constant 0 : i32
    %c0_i32_0 = arith.constant 0 : i32
    %c0_i32_1 = arith.constant 0 : i32
    return %c0_i32, %c0_i32_0 : i32, i32
  }
  func.func @transform_9(%arg0: i32) -> (i32, i32) {
    %c0_i32 = arith.constant 0 : i32
    %c0_i32_0 = arith.constant 0 : i32
    %c0_i32_1 = arith.constant 0 : i32
    return %c0_i32, %c0_i32_0 : i32, i32
  }
  func.func @transform_10(%arg0: i32) -> (i32, i32) {
    %c0_i32 = arith.constant 0 : i32
    %c0_i32_0 = arith.constant 0 : i32
    %c0_i32_1 = arith.constant 0 : i32
    return %c0_i32, %c0_i32_0 : i32, i32
  }
  func.func @transform_11(%arg0: i32) -> (i32, i32) {
    %c0_i32 = arith.constant 0 : i32
    %c0_i32_0 = arith.constant 0 : i32
    return %arg0, %c0_i32 : i32, i32
  }
}

</mosaic_0001>

<bundles_post_ra>
// kernel: dqn_forward.1
= control target key start
LH: loop header
LB: loop body
LE: loop exit
PB: predicated region body
PF: predicated region fallthrough
CT: control target
= control target key end

     0   :  { %16 = vsyncpa [#allocation3], 0  ;;  %s2247_s0 = inlined_call_operand.hbm [shape: f32[8,16], index: 0, kind: input, shape index: {}]   ;;  %s2248_s1 = inlined_call_operand.hbm [shape: bf16[16,256], index: 1, kind: input, shape index: {}]   ;;  %s2249_s2 = inlined_call_operand.vmem [shape: f32[1,256], index: 2, kind: input, shape index: {}]   ;;  %s2250_s3 = inlined_call_operand.hbm [shape: bf16[256,512], index: 3, kind: input, shape index: {}]   ;;  %s2251_s4 = inlined_call_operand.vmem [shape: f32[1,512], index: 4, kind: input, shape index: {}]   ;;  %s2252_s5 = inlined_call_operand.hbm [shape: bf16[512,256], index: 5, kind: input, shape index: {}]   ;;  %s2253_s6 = inlined_call_operand.vmem [shape: f32[1,256], index: 6, kind: input, shape index: {}]   ;;  %s2254_s7 = inlined_call_operand.hbm [shape: bf16[256,128], index: 7, kind: input, shape index: {}]   ;;  %s2255_s8 = inlined_call_operand.vmem [shape: f32[1,128], index: 8, kind: input, shape index: {}]   ;;  %s2256_s9 = inlined_call_operand.hbm [shape: bf16[128,128], index: 9, kind: input, shape index: {}]   ;;  %s2257_s10 = inlined_call_operand.vmem [shape: f32[1,128], index: 10, kind: input, shape index: {}]   ;;  %s2258_s11 = inlined_call_operand.vmem [shape: f32[8,128], index: 11, kind: output, shape index: {}]  }
   0x1   :  { %17 = vsyncpa [#allocation5], 0 }
   0x2   :  { %18 = vsyncpa [#allocation8], 0 }
   0x3   :  { %19 = vsyncpa [#allocation11], 0  ;;  %s2057_s17 = smov [#allocation4]   ;;  %s1917_s21 = scalar_lea.hbm %s2248_s1, 256 }
   0x4   :  { %s35_s18 = sshll.u32 %s2057_s17, 4  ;;  %p1918_p0 = scmp.ne.s32.totalorder %s2248_s1, %s1917_s21  ;;  %s36_s18 = int_to_ptr.vmem [resolvable:$true] %s35_s18 }
   0x5   :  { %p1921_p1 = scmp.lt.u32.totalorder %s1917_s21, %s2248_s1 }
   0x7   :  { %p1923_p2 = pnand %p1921_p1, %p1918_p0 }
   0x9   :  { %1926 = shalt.err (!%p1923_p2)
}
   0xa   :  { %s1927_s26 = scalar_lea.vmem %s36_s18, 256  ;;  %p1932_p4 = scmp.lt.s32.totalorder %s36_s18, %s36_s18 }
   0xb   :  { %p1928_p3 = scmp.ne.s32.totalorder %s36_s18, %s1927_s26  ;;  %p1933_p5 = scmp.lt.s32.totalorder %s1927_s26, %s1927_s26 }
   0xd   :  { %p1934_p6 = por %p1933_p5, %p1932_p4 }
   0xf   :  { %p1935_p7 = pnand %p1934_p6, %p1928_p3 }
  0x11   :  { %1938 = shalt.err (!%p1935_p7)
}
  0x12   :  { %s2058_s27 = smov 128   ;;  %s2059_s28 = smov 8  }
  0x13   :  { %41 = dma.hbm_to_vmem [thread:$0]  %s2248_s1, 256, %s36_s18, [#allocation5], %s2058_s27, %s2058_s27, %s2059_s28  }
  0x14   :  { %s2060_s12 = smov [#allocation7]   ;;  %s2061_s14 = smov [#allocation2]  }
  0x15   :  { %s63_s13 = sshll.u32 %s2060_s12, 4  ;;  %s26_s15 = sshll.u32 %s2061_s14, 4  ;;  %s64_s13 = int_to_ptr.vmem [resolvable:$true] %s63_s13  ;;  %s27_s15 = int_to_ptr.vmem [resolvable:$true] %s26_s15 }
  0x16   :  { %s1939_s19 = scalar_lea.hbm %s2252_s5, 8192 }
  0x17   :  { %p1940_p8 = scmp.ne.s32.totalorder %s2252_s5, %s1939_s19  ;;  %p1943_p9 = scmp.lt.u32.totalorder %s1939_s19, %s2252_s5 }
  0x19   :  { %p1945_p10 = pnand %p1943_p9, %p1940_p8 }
  0x1b   :  { %1948 = shalt.err (!%p1945_p10)
}
  0x1c   :  { %s1949_s1 = scalar_lea.vmem %s64_s13, 8192  ;;  %p1954_p12 = scmp.lt.s32.totalorder %s64_s13, %s64_s13 }
  0x1d   :  { %p1950_p11 = scmp.ne.s32.totalorder %s64_s13, %s1949_s1  ;;  %p1955_p13 = scmp.lt.s32.totalorder %s1949_s1, %s1949_s1 }
  0x1f   :  { %p1956_p0 = por %p1955_p13, %p1954_p12 }
  0x21   :  { %p1957_p1 = pnand %p1956_p0, %p1950_p11 }
  0x23   :  { %1960 = shalt.err (!%p1957_p1)
}
  0x24   :  { %69 = dma.hbm_to_vmem [thread:$0]  %s2252_s5, 8192, %s64_s13, [#allocation8], %s2058_s27, %s2058_s27, %s2059_s28  }
  0x25   :  { %s1961_s29 = scalar_lea.hbm %s2247_s0, 128 }
  0x26   :  { %p1962_p2 = scmp.ne.s32.totalorder %s2247_s0, %s1961_s29  ;;  %p1965_p3 = scmp.lt.u32.totalorder %s1961_s29, %s2247_s0 }
  0x28   :  { %p1967_p4 = pnand %p1965_p3, %p1962_p2 }
  0x2a   :  { %1970 = shalt.err (!%p1967_p4)
}
  0x2b   :  { %s1971_s17 = scalar_lea.vmem %s27_s15, 128  ;;  %p1976_p6 = scmp.lt.s32.totalorder %s27_s15, %s27_s15 }
  0x2c   :  { %p1972_p5 = scmp.ne.s32.totalorder %s27_s15, %s1971_s17  ;;  %p1977_p7 = scmp.lt.s32.totalorder %s1971_s17, %s1971_s17 }
  0x2e   :  { %p1978_p8 = por %p1977_p7, %p1976_p6 }
  0x30   :  { %p1979_p9 = pnand %p1978_p8, %p1972_p5 }
  0x32   :  { %1982 = shalt.err (!%p1979_p9)
}
  0x33   :  { %29 = dma.hbm_to_vmem [thread:$0]  %s2247_s0, 128, %s27_s15, [#allocation3]  }
  0x34   :  { %s2062_s28 = smov [#allocation6]   ;;  %s1983_s21 = scalar_lea.hbm %s2250_s3, 8192 }
  0x35   :  { %s49_s13 = sshll.u32 %s2062_s28, 4  ;;  %p1984_p10 = scmp.ne.s32.totalorder %s2250_s3, %s1983_s21  ;;  %s50_s13 = int_to_ptr.vmem [resolvable:$true] %s49_s13 }
  0x36   :  { %p1987_p11 = scmp.lt.u32.totalorder %s1983_s21, %s2250_s3 }
  0x38   :  { %p1989_p12 = pnand %p1987_p11, %p1984_p10 }
  0x3a   :  { %1992 = shalt.err (!%p1989_p12)
}
  0x3b   :  { %s1993_s24 = scalar_lea.vmem %s50_s13, 8192  ;;  %p1998_p0 = scmp.lt.s32.totalorder %s50_s13, %s50_s13 }
  0x3c   :  { %p1994_p13 = scmp.ne.s32.totalorder %s50_s13, %s1993_s24  ;;  %p1999_p1 = scmp.lt.s32.totalorder %s1993_s24, %s1993_s24 }
  0x3e   :  { %p2000_p2 = por %p1999_p1, %p1998_p0 }
  0x40   :  { %p2001_p3 = pnand %p2000_p2, %p1994_p13 }
  0x42   :  { %2004 = shalt.err (!%p2001_p3)
}
  0x43   :  { %s2063_s0 = smov 256   ;;  %s2064_s15 = smov 16  }
  0x44   :  { %55 = dma.hbm_to_vmem [thread:$0]  %s2250_s3, 8192, %s50_s13, [#allocation5], %s2063_s0, %s2063_s0, %s2064_s15  }
  0x45   :  { %s2065_s29 = smov [#allocation9]   ;;  %s2005_s16 = scalar_lea.hbm %s2254_s7, 2048 }
  0x46   :  { %s77_s30 = sshll.u32 %s2065_s29, 4  ;;  %p2006_p4 = scmp.ne.s32.totalorder %s2254_s7, %s2005_s16  ;;  %s78_s30 = int_to_ptr.vmem [resolvable:$true] %s77_s30 }
  0x47   :  { %p2009_p5 = scmp.lt.u32.totalorder %s2005_s16, %s2254_s7 }
  0x49   :  { %p2011_p6 = pnand %p2009_p5, %p2006_p4 }
  0x4b   :  { %2014 = shalt.err (!%p2011_p6)
}
  0x4c   :  { %s2015_s19 = scalar_lea.vmem %s78_s30, 2048  ;;  %p2020_p8 = scmp.lt.s32.totalorder %s78_s30, %s78_s30 }
  0x4d   :  { %p2016_p7 = scmp.ne.s32.totalorder %s78_s30, %s2015_s19  ;;  %p2021_p9 = scmp.lt.s32.totalorder %s2015_s19, %s2015_s19 }
  0x4f   :  { %p2022_p10 = por %p2021_p9, %p2020_p8 }
  0x51   :  { %p2023_p11 = pnand %p2022_p10, %p2016_p7 }
  0x53   :  { %2026 = shalt.err (!%p2023_p11)
}
  0x54   :  { %s2066_s3 = smov 64   ;;  %s2067_s13 = smov 4  }
  0x55   :  { %83 = dma.hbm_to_vmem [thread:$0]  %s2254_s7, 2048, %s78_s30, [#allocation8], %s2066_s3, %s2066_s3, %s2067_s13  }
  0x56   :  { %s2068_s22 = smov [#allocation10]   ;;  %s2027_s24 = scalar_lea.hbm %s2256_s9, 1024 }
  0x57   :  { %s91_s23 = sshll.u32 %s2068_s22, 4  ;;  %p2028_p12 = scmp.ne.s32.totalorder %s2256_s9, %s2027_s24  ;;  %s92_s23 = int_to_ptr.vmem [resolvable:$true] %s91_s23 }
  0x58   :  { %p2031_p13 = scmp.lt.u32.totalorder %s2027_s24, %s2256_s9 }
  0x5a   :  { %p2033_p0 = pnand %p2031_p13, %p2028_p12 }
  0x5c   :  { %2036 = shalt.err (!%p2033_p0)
}
  0x5d   :  { %s2037_s29 = scalar_lea.vmem %s92_s23, 1024  ;;  %p2042_p2 = scmp.lt.s32.totalorder %s92_s23, %s92_s23 }
  0x5e   :  { %p2038_p1 = scmp.ne.s32.totalorder %s92_s23, %s2037_s29  ;;  %p2043_p3 = scmp.lt.s32.totalorder %s2037_s29, %s2037_s29 }
  0x60   :  { %p2044_p4 = por %p2043_p3, %p2042_p2 }
  0x62   :  { %p2045_p5 = pnand %p2044_p4, %p2038_p1 }
  0x64   :  { %2048 = shalt.err (!%p2045_p5)
}
  0x65   :  { %97 = dma.hbm_to_vmem [thread:$0]  %s2256_s9, 1024, %s92_s23, [#allocation11], %s2066_s3, %s2066_s3, %s2067_s13  }
  0x66   :  { %2049 = dma.done.wait [#allocation3], 128  }
  0x67   :  { %2050 = vsyncadd [#allocation3], 4294967168 }
  0x68   :  { %2051 = dma.done.wait [#allocation5], 8448  }
  0x69   :  { %2052 = vsyncadd [#allocation5], 4294958848 }
  0x6a   :  { %2053 = dma.done.wait [#allocation8], 10240  }
  0x6b   :  { %2054 = vsyncadd [#allocation8], 4294957056 }
  0x6c   :  { %2055 = dma.done.wait [#allocation11], 1024  }
  0x6d   :  { %2056 = vsyncadd [#allocation11], 4294966272  ;;  %v2069_v0 = vmov 0   ;;  %v1698_v1 = vld [vmem:[#allocation4 + $0x4] ss:$8 sps:$4 sm:$0xff]   ;;  %v119_v3 = vld [vmem:[#allocation2] sm:$0xff] }
  0x6e   :  { %181 = vmatprep.mubr.bf16.mxu0 %v2069_v0  ;;  %v1700_v2 = vld [vmem:[#allocation4] ss:$8 sps:$4 sm:$0xff]   ;;  %149 = vmatprep.subr.bf16.mxu0 %v1698_v1  ;;  %v120_v4 = vpack.c.bf16 %v119_v3, %v119_v3  ;;  %v1701_v5 = vld [vmem:[#allocation6 + $0x4] ss:$16 sps:$4 sm:$0xff]   ;;  %vm145_vm0 = vcmask 130048   ;;  %vm2071_vm1 = vmmov 0  }
  0x6f   :  { %150 = vmatpush1.bf16.msra.mxu0 %v1700_v2  ;;  %v1703_v6 = vld [vmem:[#allocation6 + $0x8] ss:$16 sps:$4 sm:$0xff]   ;;  %v1705_v7 = vld [vmem:[#allocation6 + $0xc] ss:$16 sps:$4 sm:$0xff]   ;;  %600 = vmatprep.subr.bf16.mxu1 %v1701_v5  ;;  %v1706_v8 = vld [vmem:[#allocation6] ss:$16 sps:$4 sm:$0xff]  }
  0x70   :  { %641 = vmatprep.subr.bf16.mxu0 %v1705_v7  ;;  %v1707_v9 = vld [vmem:[#allocation6 + $0x24] ss:$16 sps:$4 sm:$0xff]   ;;  %601 = vmatpush1.bf16.msra.mxu1 %v1706_v8  ;;  %v1709_v10 = vld [vmem:[#allocation6 + $0x28] ss:$16 sps:$4 sm:$0xff]   ;;  %v1711_v11 = vld [vmem:[#allocation6 + $0x2c] ss:$16 sps:$4 sm:$0xff]  }
  0x71   :  { %v1712_v12 = vld [vmem:[#allocation6 + $0x20] ss:$16 sps:$4 sm:$0xff]   ;;  %602 = vmatprep.subr.bf16.mxu1 %v1707_v9  ;;  %v1713_v13 = vld [vmem:[#allocation6 + $0x44] ss:$16 sps:$4 sm:$0xff]   ;;  %v1717_v14 = vld [vmem:[#allocation6 + $0x4c] ss:$16 sps:$4 sm:$0xff]  }
  0x72   :  { %1471 = vmatmul.mubr.msk.bf16.vlgmr.msra.gmra.mrb[0].mxu0 %vm145_vm0, %v120_v4  ;;  %v1718_v15 = vld [vmem:[#allocation6 + $0x40] ss:$16 sps:$4 sm:$0xff]   ;;  %v1715_v16 = vld [vmem:[#allocation6 + $0x48] ss:$16 sps:$4 sm:$0xff]   ;;  %v1719_v17 = vld [vmem:[#allocation6 + $0x64] ss:$16 sps:$4 sm:$0xff]  }
  0x73   :  { %642 = vmatpush1.bf16.msra.mxu0 %v1703_v6  ;;  %v1723_v18 = vld [vmem:[#allocation6 + $0x6c] ss:$16 sps:$4 sm:$0xff]   ;;  %v1721_v19 = vld [vmem:[#allocation6 + $0x68] ss:$16 sps:$4 sm:$0xff]   ;;  %v1724_v20 = vld [vmem:[#allocation6 + $0x60] ss:$16 sps:$4 sm:$0xff]   ;;  %v125_v6 = vlaneseq }
  0x74   :  { %643 = vmatprep.subr.bf16.mxu0 %v1711_v11  ;;  %603 = vmatpush1.bf16.msra.mxu1 %v1712_v12  ;;  %v1725_v21 = vld [vmem:[#allocation6 + $0x84] ss:$16 sps:$4 sm:$0xff]   ;;  %v1729_v22 = vld [vmem:[#allocation6 + $0x8c] ss:$16 sps:$4 sm:$0xff]   ;;  %v1730_v23 = vld [vmem:[#allocation6 + $0x80] ss:$16 sps:$4 sm:$0xff]  }
  0x75   :  { %604 = vmatprep.subr.bf16.mxu1 %v1713_v13  ;;  %v1727_v24 = vld [vmem:[#allocation6 + $0x88] ss:$16 sps:$4 sm:$0xff]   ;;  %v1731_v25 = vld [vmem:[#allocation6 + $0xa4] ss:$16 sps:$4 sm:$0xff]   ;;  %v1735_v26 = vld [vmem:[#allocation6 + $0xac] ss:$16 sps:$4 sm:$0xff]  }
  0x76   :  { %v1733_v27 = vld [vmem:[#allocation6 + $0xa8] ss:$16 sps:$4 sm:$0xff]   ;;  %v1736_v28 = vld [vmem:[#allocation6 + $0xa0] ss:$16 sps:$4 sm:$0xff]   ;;  %v1737_v29 = vld [vmem:[#allocation6 + $0xc4] ss:$16 sps:$4 sm:$0xff]  }
  0x77   :  { %644 = vmatpush1.bf16.msra.mxu0 %v1709_v10  ;;  %v1741_v30 = vld [vmem:[#allocation6 + $0xcc] ss:$16 sps:$4 sm:$0xff]   ;;  %v1742_v31 = vld [vmem:[#allocation6 + $0xc0] ss:$16 sps:$4 sm:$0xff]   ;;  %v1739_v32 = vld [vmem:[#allocation6 + $0xc8] ss:$16 sps:$4 sm:$0xff]  }
  0x78   :  { %645 = vmatprep.subr.bf16.mxu0 %v1717_v14  ;;  %605 = vmatpush1.bf16.msra.mxu1 %v1718_v15  ;;  %v1743_v33 = vld [vmem:[#allocation6 + $0xe4] ss:$16 sps:$4 sm:$0xff]   ;;  %v1747_v34 = vld [vmem:[#allocation6 + $0xec] ss:$16 sps:$4 sm:$0xff]   ;;  %v1745_v35 = vld [vmem:[#allocation6 + $0xe8] ss:$16 sps:$4 sm:$0xff]  }
  0x79   :  { %606 = vmatprep.subr.bf16.mxu1 %v1719_v17  ;;  %v1748_v36 = vld [vmem:[#allocation6 + $0xe0] ss:$16 sps:$4 sm:$0xff]   ;;  %v1749_v37 = vld [vmem:[#allocation6 + $0x104] ss:$16 sps:$4 sm:$0xff]   ;;  %v1753_v38 = vld [vmem:[#allocation6 + $0x10c] ss:$16 sps:$4 sm:$0xff]  }
  0x7a   :  { %v1754_v39 = vld [vmem:[#allocation6 + $0x100] ss:$16 sps:$4 sm:$0xff]   ;;  %v1751_v40 = vld [vmem:[#allocation6 + $0x108] ss:$16 sps:$4 sm:$0xff]   ;;  %v1755_v41 = vld [vmem:[#allocation6 + $0x124] ss:$16 sps:$4 sm:$0xff]  }
  0x7b   :  { %646 = vmatpush1.bf16.msra.mxu0 %v1715_v16  ;;  %v1759_v42 = vld [vmem:[#allocation6 + $0x12c] ss:$16 sps:$4 sm:$0xff]   ;;  %v1757_v43 = vld [vmem:[#allocation6 + $0x128] ss:$16 sps:$4 sm:$0xff]   ;;  %v1760_v44 = vld [vmem:[#allocation6 + $0x120] ss:$16 sps:$4 sm:$0xff]  }
  0x7c   :  { %647 = vmatprep.subr.bf16.mxu0 %v1723_v18  ;;  %607 = vmatpush1.bf16.msra.mxu1 %v1724_v20  ;;  %v1761_v45 = vld [vmem:[#allocation6 + $0x144] ss:$16 sps:$4 sm:$0xff]   ;;  %v1765_v46 = vld [vmem:[#allocation6 + $0x14c] ss:$16 sps:$4 sm:$0xff]   ;;  %v1766_v47 = vld [vmem:[#allocation6 + $0x140] ss:$16 sps:$4 sm:$0xff]  }
  0x7d   :  { %608 = vmatprep.subr.bf16.mxu1 %v1725_v21  ;;  %v1763_v48 = vld [vmem:[#allocation6 + $0x148] ss:$16 sps:$4 sm:$0xff]   ;;  %v1767_v49 = vld [vmem:[#allocation6 + $0x164] ss:$16 sps:$4 sm:$0xff]   ;;  %v1771_v50 = vld [vmem:[#allocation6 + $0x16c] ss:$16 sps:$4 sm:$0xff]  }
  0x7e   :  { %v1772_v51 = vld [vmem:[#allocation6 + $0x160] ss:$16 sps:$4 sm:$0xff]   ;;  %v1769_v52 = vld [vmem:[#allocation6 + $0x168] ss:$16 sps:$4 sm:$0xff]   ;;  %v1773_v53 = vld [vmem:[#allocation6 + $0x184] ss:$16 sps:$4 sm:$0xff]  }
  0x7f   :  { %648 = vmatpush1.bf16.msra.mxu0 %v1721_v19  ;;  %v1777_v54 = vld [vmem:[#allocation6 + $0x18c] ss:$16 sps:$4 sm:$0xff]   ;;  %v1778_v55 = vld [vmem:[#allocation6 + $0x180] ss:$16 sps:$4 sm:$0xff]   ;;  %v1775_v56 = vld [vmem:[#allocation6 + $0x188] ss:$16 sps:$4 sm:$0xff]  }
  0x80   :  { %649 = vmatprep.subr.bf16.mxu0 %v1729_v22  ;;  %609 = vmatpush1.bf16.msra.mxu1 %v1730_v23  ;;  %v1779_v57 = vld [vmem:[#allocation6 + $0x1a4] ss:$16 sps:$4 sm:$0xff]   ;;  %v1783_v58 = vld [vmem:[#allocation6 + $0x1ac] ss:$16 sps:$4 sm:$0xff]   ;;  %v1784_v59 = vld [vmem:[#allocation6 + $0x1a0] ss:$16 sps:$4 sm:$0xff]  }
  0x81   :  { %610 = vmatprep.subr.bf16.mxu1 %v1731_v25  ;;  %v1781_v60 = vld [vmem:[#allocation6 + $0x1a8] ss:$16 sps:$4 sm:$0xff]   ;;  %v1785_v61 = vld [vmem:[#allocation6 + $0x1c4] ss:$16 sps:$4 sm:$0xff]   ;;  %v1789_v62 = vld [vmem:[#allocation6 + $0x1cc] ss:$16 sps:$4 sm:$0xff]  }
  0x82   :  { %v1787_v63 = vld [vmem:[#allocation6 + $0x1c8] ss:$16 sps:$4 sm:$0xff]   ;;  %v1790_v0 = vld [vmem:[#allocation6 + $0x1c0] ss:$16 sps:$4 sm:$0xff]   ;;  %v1791_v1 = vld [vmem:[#allocation6 + $0x1e4] ss:$16 sps:$4 sm:$0xff]  }
  0x83   :  { %650 = vmatpush1.bf16.msra.mxu0 %v1727_v24  ;;  %v1795_v2 = vld [vmem:[#allocation6 + $0x1ec] ss:$16 sps:$4 sm:$0xff]   ;;  %v1793_v3 = vld [vmem:[#allocation6 + $0x1e8] ss:$16 sps:$4 sm:$0xff]   ;;  %v1796_v4 = vld [vmem:[#allocation6 + $0x1e0] ss:$16 sps:$4 sm:$0xff]  }
  0x84   :  { %651 = vmatprep.subr.bf16.mxu0 %v1735_v26  ;;  %611 = vmatpush1.bf16.msra.mxu1 %v1736_v28  ;;  %v1799_v5 = vld [vmem:[#allocation7 + $0x4] ss:$8 sps:$4 sm:$0xff]   ;;  %v2204_v7 = vshrl.u32 %v125_v6, 7  ;;  %v123_v9 = vld [vmem:[%s2249_s2] sm:$0x3] }
  0x85   :  { %612 = vmatprep.subr.bf16.mxu1 %v1737_v29  ;;  %v1797_v22 = vld [vmem:[#allocation7] ss:$8 sps:$4 sm:$0xff]   ;;  %v1802_v24 = vld [vmem:[#allocation7 + $0x14] ss:$8 sps:$4 sm:$0xff]   ;;  %v1800_v25 = vld [vmem:[#allocation7 + $0x10] ss:$8 sps:$4 sm:$0xff]  }
  0x86   :  { %v2207_v8 = vsub.s32 0, %v2204_v7  ;;  %v2213_v10 = vsub.s32 1, %v2204_v7  ;;  %v1805_v26 = vld [vmem:[#allocation7 + $0x24] ss:$8 sps:$4 sm:$0xff]   ;;  %v1808_v28 = vld [vmem:[#allocation7 + $0x34] ss:$8 sps:$4 sm:$0xff]  }
  0x87   :  { %652 = vmatpush1.bf16.msra.mxu0 %v1733_v27  ;;  %v1803_v27 = vld [vmem:[#allocation7 + $0x20] ss:$8 sps:$4 sm:$0xff]   ;;  %v1806_v29 = vld [vmem:[#allocation7 + $0x30] ss:$8 sps:$4 sm:$0xff]  }
  0x88   :  { %653 = vmatprep.subr.bf16.mxu0 %v1741_v30  ;;  %613 = vmatpush1.bf16.msra.mxu1 %v1742_v31  ;;  %v128_v11 = vrot.slane %v123_v9, %v2207_v8  ;;  %v132_v12 = vrot.slane %v123_v9, %v2213_v10  ;;  %v1811_v30 = vld [vmem:[#allocation7 + $0x44] ss:$8 sps:$4 sm:$0xff]   ;;  %v1809_v31 = vld [vmem:[#allocation7 + $0x40] ss:$8 sps:$4 sm:$0xff]  }
  0x89   :  { %614 = vmatprep.subr.bf16.mxu1 %v1743_v33  ;;  %v1812_v33 = vld [vmem:[#allocation7 + $0x50] ss:$8 sps:$4 sm:$0xff]  }
  0x8b   :  { %654 = vmatpush1.bf16.msra.mxu0 %v1739_v32  ;;  %v1814_v32 = vld [vmem:[#allocation7 + $0x54] ss:$8 sps:$4 sm:$0xff]  }
  0x8c   :  { %655 = vmatprep.subr.bf16.mxu0 %v1747_v34  ;;  %615 = vmatpush1.bf16.msra.mxu1 %v1748_v36  ;;  %v1817_v34 = vld [vmem:[#allocation7 + $0x64] ss:$8 sps:$4 sm:$0xff]   ;;  %v1820_v36 = vld [vmem:[#allocation7 + $0x74] ss:$8 sps:$4 sm:$0xff]  }
  0x8d   :  { %616 = vmatprep.subr.bf16.mxu1 %v1749_v37  ;;  %v1818_v37 = vld [vmem:[#allocation7 + $0x70] ss:$8 sps:$4 sm:$0xff]  }
  0x8f   :  { %656 = vmatpush1.bf16.msra.mxu0 %v1745_v35  ;;  %v1815_v35 = vld [vmem:[#allocation7 + $0x60] ss:$8 sps:$4 sm:$0xff]  }
  0x90   :  { %657 = vmatprep.subr.bf16.mxu0 %v1753_v38  ;;  %617 = vmatpush1.bf16.msra.mxu1 %v1754_v39  ;;  %v1823_v38 = vld [vmem:[#allocation7 + $0x84] ss:$8 sps:$4 sm:$0xff]   ;;  %v1821_v39 = vld [vmem:[#allocation7 + $0x80] ss:$8 sps:$4 sm:$0xff]  }
  0x91   :  { %618 = vmatprep.subr.bf16.mxu1 %v1755_v41  ;;  %v1824_v41 = vld [vmem:[#allocation7 + $0x90] ss:$8 sps:$4 sm:$0xff]  }
  0x93   :  { %658 = vmatpush1.bf16.msra.mxu0 %v1751_v40  ;;  %v1826_v40 = vld [vmem:[#allocation7 + $0x94] ss:$8 sps:$4 sm:$0xff]  }
  0x94   :  { %659 = vmatprep.subr.bf16.mxu0 %v1759_v42  ;;  %619 = vmatpush1.bf16.msra.mxu1 %v1760_v44  ;;  %v1829_v42 = vld [vmem:[#allocation7 + $0xa4] ss:$8 sps:$4 sm:$0xff]   ;;  %v1832_v44 = vld [vmem:[#allocation7 + $0xb4] ss:$8 sps:$4 sm:$0xff]  }
  0x95   :  { %620 = vmatprep.subr.bf16.mxu1 %v1761_v45  ;;  %v1830_v45 = vld [vmem:[#allocation7 + $0xb0] ss:$8 sps:$4 sm:$0xff]  }
  0x97   :  { %660 = vmatpush1.bf16.msra.mxu0 %v1757_v43  ;;  %v1827_v43 = vld [vmem:[#allocation7 + $0xa0] ss:$8 sps:$4 sm:$0xff]  }
  0x98   :  { %661 = vmatprep.subr.bf16.mxu0 %v1765_v46  ;;  %621 = vmatpush1.bf16.msra.mxu1 %v1766_v47  ;;  %v1835_v46 = vld [vmem:[#allocation7 + $0xc4] ss:$8 sps:$4 sm:$0xff]   ;;  %v1833_v47 = vld [vmem:[#allocation7 + $0xc0] ss:$8 sps:$4 sm:$0xff]  }
  0x99   :  { %622 = vmatprep.subr.bf16.mxu1 %v1767_v49  ;;  %v1836_v49 = vld [vmem:[#allocation7 + $0xd0] ss:$8 sps:$4 sm:$0xff]  }
  0x9b   :  { %662 = vmatpush1.bf16.msra.mxu0 %v1763_v48  ;;  %v1838_v48 = vld [vmem:[#allocation7 + $0xd4] ss:$8 sps:$4 sm:$0xff]  }
  0x9c   :  { %663 = vmatprep.subr.bf16.mxu0 %v1771_v50  ;;  %623 = vmatpush1.bf16.msra.mxu1 %v1772_v51  ;;  %v1841_v50 = vld [vmem:[#allocation7 + $0xe4] ss:$8 sps:$4 sm:$0xff]   ;;  %v1839_v51 = vld [vmem:[#allocation7 + $0xe0] ss:$8 sps:$4 sm:$0xff]  }
  0x9d   :  { %624 = vmatprep.subr.bf16.mxu1 %v1773_v53  ;;  %v1842_v53 = vld [vmem:[#allocation7 + $0xf0] ss:$8 sps:$4 sm:$0xff]  }
  0x9f   :  { %664 = vmatpush1.bf16.msra.mxu0 %v1769_v52  ;;  %v1844_v52 = vld [vmem:[#allocation7 + $0xf4] ss:$8 sps:$4 sm:$0xff]  }
  0xa0   :  { %665 = vmatprep.subr.bf16.mxu0 %v1777_v54  ;;  %625 = vmatpush1.bf16.msra.mxu1 %v1778_v55  ;;  %v1847_v54 = vld [vmem:[#allocation7 + $0x104] ss:$8 sps:$4 sm:$0xff]  }
  0xa1   :  { %626 = vmatprep.subr.bf16.mxu1 %v1779_v57  ;;  %v1893_v55 = vld [vmem:[#allocation9 + $0x40] sm:$0xff]   ;;  %v1895_v57 = vld [vmem:[#allocation9 + $0x48] sm:$0xff]  }
  0xa3   :  { %666 = vmatpush1.bf16.msra.mxu0 %v1775_v56  ;;  %v1894_v56 = vld [vmem:[#allocation9] sm:$0xff]  }
  0xa4   :  { %667 = vmatprep.subr.bf16.mxu0 %v1783_v58  ;;  %627 = vmatpush1.bf16.msra.mxu1 %v1784_v59  ;;  %v1896_v58 = vld [vmem:[#allocation9 + $0x8] sm:$0xff]   ;;  %v1897_v59 = vld [vmem:[#allocation9 + $0x50] sm:$0xff]  }
  0xa5   :  { %628 = vmatprep.subr.bf16.mxu1 %v1785_v61  ;;  %v1899_v61 = vld [vmem:[#allocation9 + $0x58] sm:$0xff]  }
  0xa7   :  { %668 = vmatpush1.bf16.msra.mxu0 %v1781_v60  ;;  %v1898_v60 = vld [vmem:[#allocation9 + $0x10] sm:$0xff]  }
  0xa8   :  { %669 = vmatprep.subr.bf16.mxu0 %v1789_v62  ;;  %629 = vmatpush1.bf16.msra.mxu1 %v1790_v0  ;;  %v1900_v62 = vld [vmem:[#allocation9 + $0x18] sm:$0xff]   ;;  %v1902_v0 = vld [vmem:[#allocation9 + $0x20] sm:$0xff]  }
  0xa9   :  { %630 = vmatprep.subr.bf16.mxu1 %v1791_v1  ;;  %v1903_v1 = vld [vmem:[#allocation9 + $0x68] sm:$0xff]  }
  0xab   :  { %670 = vmatpush1.bf16.msra.mxu0 %v1787_v63  ;;  %v1901_v63 = vld [vmem:[#allocation9 + $0x60] sm:$0xff]  }
  0xac   :  { %671 = vmatprep.subr.bf16.mxu0 %v1795_v2  ;;  %631 = vmatpush1.bf16.msra.mxu1 %v1796_v4  ;;  %v1904_v2 = vld [vmem:[#allocation9 + $0x28] sm:$0xff]   ;;  %v274_v4 = vsub.s32 3, %v2204_v7 }
  0xad   :  { %1086 = vmatprep.subr.bf16.mxu1 %v1799_v5 }
  0xaf   :  { %672 = vmatpush1.bf16.msra.mxu0 %v1793_v3  ;;  %v2220_v3 = vld [vmem:[%s2251_s4] sm:$0xf] }
  0xb0   :  { %1626 = vmatprep.subr.bf16.mxu0 %v1893_v55  ;;  %v263_v5 = vrot.slane %v2220_v3, %v2207_v8  ;;  %v267_v6 = vrot.slane %v2220_v3, %v2213_v10  ;;  %v275_v9 = vrot.slane %v2220_v3, %v274_v4  ;;  %v1884_v55 = vld [vmem:[#allocation7 + $0x1d0] ss:$8 sps:$4 sm:$0xff]   ;;  %v754_v4 = vld [vmem:[%s2253_s6] sm:$0x3] }
 0x145   :  { %v183_v13 = vpop.f32.mrb[0].mxu0 }
 0x146   :  { %v184_v14 = vadd.f32 %v183_v13, %v128_v11  ;;  %v185_v15 = vpop.f32.mrb[1].mxu0 }
 0x147   :  { %v186_v16 = vadd.f32 %v185_v15, %v132_v12  ;;  %v187_v17 = vpop.f32.mrb[2].mxu0 }
 0x148   :  { %v190_v18 = vmax.f32 %v184_v14, 0.0  ;;  %v188_v19 = vpop.f32.mrb[3].mxu0 }
 0x149   :  { %v191_v20 = vmax.f32 %v186_v16, 0.0 }
 0x14a   :  { %v192_v23 = vpack.c.bf16 %v190_v18, %v190_v18 }
 0x14b   :  { %v193_v21 = vpack.c.bf16 %v191_v20, %v191_v20 }
 0x14d   :  { %632 = vmatprep.mubr.bf16.mxu1 %v193_v21  ;;  %673 = vmatprep.mubr.bf16.mxu0 %v193_v21 }
 0x14e   :  { %633 = vmatmul.mubr.bf16.vlgmr.msra.gmra.mrb[0].mxu1 %v192_v23  ;;  %674 = vmatmul.mubr.bf16.vlgmr.msra.gmra.mrb[4].mxu0 %v192_v23 }
 0x14f   :  { %1087 = vmatpush1.bf16.msra.mxu1 %v1797_v22  ;;  %1627 = vmatpush3.bf16.msra.mxu0 %v1894_v56 }
 0x150   :  { %1088 = vmatprep.subr.bf16.mxu1 %v1802_v24  ;;  %1628 = vmatprep.subr.bf16.mxu0 %v1895_v57  ;;  %v1889_v57 = vld [vmem:[#allocation7 + $0x1e4] ss:$8 sps:$4 sm:$0xff]  }
 0x153   :  { %1089 = vmatpush1.bf16.msra.mxu1 %v1800_v25  ;;  %1629 = vmatpush3.bf16.msra.mxu0 %v1896_v58  ;;  %v1887_v58 = vld [vmem:[#allocation7 + $0x1e0] ss:$8 sps:$4 sm:$0xff]  }
 0x154   :  { %1090 = vmatprep.subr.bf16.mxu1 %v1805_v26  ;;  %1630 = vmatprep.subr.bf16.mxu0 %v1897_v59  ;;  %v1845_v26 = vld [vmem:[#allocation7 + $0x100] ss:$8 sps:$4 sm:$0xff]  }
 0x157   :  { %1091 = vmatpush1.bf16.msra.mxu1 %v1803_v27  ;;  %1631 = vmatpush3.bf16.msra.mxu0 %v1898_v60  ;;  %v1892_v60 = vld [vmem:[#allocation7 + $0x1f4] ss:$8 sps:$4 sm:$0xff]  }
 0x158   :  { %1092 = vmatprep.subr.bf16.mxu1 %v1808_v28  ;;  %1632 = vmatprep.subr.bf16.mxu0 %v1899_v61  ;;  %v1850_v28 = vld [vmem:[#allocation7 + $0x114] ss:$8 sps:$4 sm:$0xff]   ;;  %v1890_v61 = vld [vmem:[#allocation7 + $0x1f0] ss:$8 sps:$4 sm:$0xff]  }
 0x15b   :  { %1093 = vmatpush1.bf16.msra.mxu1 %v1806_v29  ;;  %1633 = vmatpush3.bf16.msra.mxu0 %v1900_v62 }
 0x15c   :  { %1094 = vmatprep.subr.bf16.mxu1 %v1811_v30  ;;  %1634 = vmatprep.subr.bf16.mxu0 %v1901_v63  ;;  %v1848_v30 = vld [vmem:[#allocation7 + $0x110] ss:$8 sps:$4 sm:$0xff]  }
 0x15d   :  { %v1905_v63 = vld [vmem:[#allocation9 + $0x70] sm:$0xff]  }
 0x15f   :  { %1095 = vmatpush1.bf16.msra.mxu1 %v1809_v31  ;;  %1635 = vmatpush3.bf16.msra.mxu0 %v1902_v0  ;;  %v1853_v31 = vld [vmem:[#allocation7 + $0x124] ss:$8 sps:$4 sm:$0xff]   ;;  %v1906_v0 = vld [vmem:[#allocation9 + $0x30] sm:$0xff]  }
 0x160   :  { %1096 = vmatprep.subr.bf16.mxu1 %v1814_v32  ;;  %1636 = vmatprep.subr.bf16.mxu0 %v1903_v1  ;;  %v1851_v32 = vld [vmem:[#allocation7 + $0x120] ss:$8 sps:$4 sm:$0xff]   ;;  %v1907_v1 = vld [vmem:[#allocation9 + $0x78] sm:$0xff]  }
 0x163   :  { %1097 = vmatpush1.bf16.msra.mxu1 %v1812_v33  ;;  %1637 = vmatpush3.bf16.msra.mxu0 %v1904_v2  ;;  %v1856_v33 = vld [vmem:[#allocation7 + $0x134] ss:$8 sps:$4 sm:$0xff]  }
 0x164   :  { %1098 = vmatprep.subr.bf16.mxu1 %v1817_v34  ;;  %v1854_v34 = vld [vmem:[#allocation7 + $0x130] ss:$8 sps:$4 sm:$0xff]   ;;  %1638 = vmatprep.subr.bf16.mxu0 %v1905_v63 }
 0x165   :  { %v1908_v2 = vld [vmem:[#allocation9 + $0x38] sm:$0xff]  }
 0x167   :  { %1099 = vmatpush1.bf16.msra.mxu1 %v1815_v35  ;;  %v1859_v35 = vld [vmem:[#allocation7 + $0x144] ss:$8 sps:$4 sm:$0xff]   ;;  %1639 = vmatpush3.bf16.msra.mxu0 %v1906_v0 }
 0x168   :  { %1100 = vmatprep.subr.bf16.mxu1 %v1820_v36  ;;  %v1857_v36 = vld [vmem:[#allocation7 + $0x140] ss:$8 sps:$4 sm:$0xff]   ;;  %1640 = vmatprep.subr.bf16.mxu0 %v1907_v1 }
 0x16b   :  { %1101 = vmatpush1.bf16.msra.mxu1 %v1818_v37  ;;  %v1862_v37 = vld [vmem:[#allocation7 + $0x154] ss:$8 sps:$4 sm:$0xff]   ;;  %1641 = vmatpush3.bf16.msra.mxu0 %v1908_v2 }
 0x16c   :  { %1102 = vmatprep.subr.bf16.mxu1 %v1823_v38  ;;  %v1860_v38 = vld [vmem:[#allocation7 + $0x150] ss:$8 sps:$4 sm:$0xff]  }
 0x16f   :  { %1103 = vmatpush1.bf16.msra.mxu1 %v1821_v39  ;;  %v1865_v39 = vld [vmem:[#allocation7 + $0x164] ss:$8 sps:$4 sm:$0xff]  }
 0x170   :  { %1104 = vmatprep.subr.bf16.mxu1 %v1826_v40  ;;  %v1863_v40 = vld [vmem:[#allocation7 + $0x160] ss:$8 sps:$4 sm:$0xff]  }
 0x173   :  { %1105 = vmatpush1.bf16.msra.mxu1 %v1824_v41  ;;  %v1868_v41 = vld [vmem:[#allocation7 + $0x174] ss:$8 sps:$4 sm:$0xff]  }
 0x174   :  { %1106 = vmatprep.subr.bf16.mxu1 %v1829_v42  ;;  %v1866_v42 = vld [vmem:[#allocation7 + $0x170] ss:$8 sps:$4 sm:$0xff]  }
 0x177   :  { %1107 = vmatpush1.bf16.msra.mxu1 %v1827_v43  ;;  %v1871_v43 = vld [vmem:[#allocation7 + $0x184] ss:$8 sps:$4 sm:$0xff]  }
 0x178   :  { %1108 = vmatprep.subr.bf16.mxu1 %v1832_v44  ;;  %v1869_v44 = vld [vmem:[#allocation7 + $0x180] ss:$8 sps:$4 sm:$0xff]  }
 0x17b   :  { %1109 = vmatpush1.bf16.msra.mxu1 %v1830_v45  ;;  %v1874_v45 = vld [vmem:[#allocation7 + $0x194] ss:$8 sps:$4 sm:$0xff]  }
 0x17c   :  { %1110 = vmatprep.subr.bf16.mxu1 %v1835_v46  ;;  %v1872_v46 = vld [vmem:[#allocation7 + $0x190] ss:$8 sps:$4 sm:$0xff]  }
 0x17f   :  { %1111 = vmatpush1.bf16.msra.mxu1 %v1833_v47  ;;  %v1877_v47 = vld [vmem:[#allocation7 + $0x1a4] ss:$8 sps:$4 sm:$0xff]  }
 0x180   :  { %1112 = vmatprep.subr.bf16.mxu1 %v1838_v48  ;;  %v1875_v48 = vld [vmem:[#allocation7 + $0x1a0] ss:$8 sps:$4 sm:$0xff]  }
 0x183   :  { %1113 = vmatpush1.bf16.msra.mxu1 %v1836_v49  ;;  %v1880_v49 = vld [vmem:[#allocation7 + $0x1b4] ss:$8 sps:$4 sm:$0xff]  }
 0x184   :  { %1114 = vmatprep.subr.bf16.mxu1 %v1841_v50  ;;  %v1878_v50 = vld [vmem:[#allocation7 + $0x1b0] ss:$8 sps:$4 sm:$0xff]  }
 0x187   :  { %1115 = vmatpush1.bf16.msra.mxu1 %v1839_v51  ;;  %v1883_v51 = vld [vmem:[#allocation7 + $0x1c4] ss:$8 sps:$4 sm:$0xff]  }
 0x188   :  { %1116 = vmatprep.subr.bf16.mxu1 %v1844_v52  ;;  %v1881_v52 = vld [vmem:[#allocation7 + $0x1c0] ss:$8 sps:$4 sm:$0xff]  }
 0x18b   :  { %1117 = vmatpush1.bf16.msra.mxu1 %v1842_v53  ;;  %v270_v53 = vsub.s32 2, %v2204_v7 }
 0x18c   :  { %1127 = vmatprep.subr.bf16.mxu1 %v1847_v54  ;;  %v1886_v54 = vld [vmem:[#allocation7 + $0x1d4] ss:$8 sps:$4 sm:$0xff]  }
 0x18d   :  { %v271_v56 = vrot.slane %v2220_v3, %v270_v53  ;;  %v2070_v3 = vmov 0.0  }
 0x18e   :  { %1657 = vmatprep.subr.bf16.mxu0 %v2070_v3 }
 0x221   :  { %v634_v11 = vpop.f32.mrb[0].mxu1  ;;  %v2228_v12 = vpop.f32.mrb[4].mxu0 }
 0x222   :  { %v635_v13 = vadd.f32 %v634_v11, %v263_v5  ;;  %v636_v14 = vpop.f32.mrb[1].mxu1  ;;  %v677_v15 = vpop.f32.mrb[5].mxu0  ;;  %v676_v59 = vadd.f32 %v2228_v12, %v271_v56  ;;  %v759_v5 = vrot.slane %v754_v4, %v2207_v8  ;;  %v1911_v8 = vld [vmem:[#allocation10 + $0x10] sm:$0xff]  }
 0x223   :  { %v637_v16 = vadd.f32 %v636_v14, %v267_v6  ;;  %v678_v17 = vadd.f32 %v677_v15, %v275_v9  ;;  %v638_v18 = vpop.f32.mrb[2].mxu1  ;;  %v679_v19 = vpop.f32.mrb[6].mxu0  ;;  %v763_v6 = vrot.slane %v754_v4, %v2213_v10  ;;  %v1912_v10 = vld [vmem:[#allocation10 + $0x18] sm:$0xff]  }
 0x224   :  { %v682_v20 = vmax.f32 %v635_v13, 0.0  ;;  %v639_v21 = vpop.f32.mrb[3].mxu1  ;;  %v680_v22 = vpop.f32.mrb[7].mxu0  ;;  %v684_v62 = vmax.f32 %v676_v59, 0.0  ;;  %v1909_v19 = vld [vmem:[#allocation10] sm:$0xff]  }
 0x225   :  { %v683_v23 = vmax.f32 %v637_v16, 0.0  ;;  %v685_v24 = vmax.f32 %v678_v17, 0.0  ;;  %v1910_v21 = vld [vmem:[#allocation10 + $0x8] sm:$0xff]   ;;  %v1913_v22 = vld [vmem:[#allocation10 + $0x20] sm:$0xff]  }
 0x226   :  { %v686_v27 = vpack.c.bf16 %v682_v20, %v682_v20  ;;  %v688_v7 = vpack.c.bf16 %v684_v62, %v684_v62 }
 0x227   :  { %v687_v25 = vpack.c.bf16 %v683_v23, %v683_v23  ;;  %v689_v29 = vpack.c.bf16 %v685_v24, %v685_v24  ;;  %v1914_v23 = vld [vmem:[#allocation10 + $0x28] sm:$0xff]   ;;  %v1915_v24 = vld [vmem:[#allocation10 + $0x30] sm:$0xff]  }
 0x229   :  { %1118 = vmatprep.mubr.bf16.mxu1 %v687_v25  ;;  %v1916_v25 = vld [vmem:[#allocation10 + $0x38] sm:$0xff]  }
 0x22a   :  { %1119 = vmatmul.mubr.bf16.vlgmr.msra.gmra.mrb[4].mxu1 %v686_v27  ;;  %v1600_v27 = vld [vmem:[%s2255_s8] ss:$0 sm:$0xff] }
 0x22b   :  { %1128 = vmatpush1.bf16.msra.mxu1 %v1845_v26  ;;  %1159 = vmatprep.mubr.bf16.mxu1 %v689_v29 }
 0x22c   :  { %1129 = vmatprep.subr.bf16.mxu1 %v1850_v28 }
 0x22f   :  { %1130 = vmatpush1.bf16.msra.mxu1 %v1848_v30 }
 0x230   :  { %1131 = vmatprep.subr.bf16.mxu1 %v1853_v31 }
 0x233   :  { %1132 = vmatpush1.bf16.msra.mxu1 %v1851_v32 }
 0x234   :  { %1133 = vmatprep.subr.bf16.mxu1 %v1856_v33 }
 0x237   :  { %1134 = vmatpush1.bf16.msra.mxu1 %v1854_v34 }
 0x238   :  { %1135 = vmatprep.subr.bf16.mxu1 %v1859_v35  ;;  %v1617_v35 = vld [vmem:[%s2257_s10] ss:$0 sm:$0xff] }
 0x23b   :  { %1136 = vmatpush1.bf16.msra.mxu1 %v1857_v36 }
 0x23c   :  { %1137 = vmatprep.subr.bf16.mxu1 %v1862_v37 }
 0x23f   :  { %1138 = vmatpush1.bf16.msra.mxu1 %v1860_v38 }
 0x240   :  { %1139 = vmatprep.subr.bf16.mxu1 %v1865_v39 }
 0x243   :  { %1140 = vmatpush1.bf16.msra.mxu1 %v1863_v40 }
 0x244   :  { %1141 = vmatprep.subr.bf16.mxu1 %v1868_v41 }
 0x247   :  { %1142 = vmatpush1.bf16.msra.mxu1 %v1866_v42 }
 0x248   :  { %1143 = vmatprep.subr.bf16.mxu1 %v1871_v43 }
 0x24b   :  { %1144 = vmatpush1.bf16.msra.mxu1 %v1869_v44 }
 0x24c   :  { %1145 = vmatprep.subr.bf16.mxu1 %v1874_v45 }
 0x24f   :  { %1146 = vmatpush1.bf16.msra.mxu1 %v1872_v46 }
 0x250   :  { %1147 = vmatprep.subr.bf16.mxu1 %v1877_v47 }
 0x253   :  { %1148 = vmatpush1.bf16.msra.mxu1 %v1875_v48 }
 0x254   :  { %1149 = vmatprep.subr.bf16.mxu1 %v1880_v49 }
 0x257   :  { %1150 = vmatpush1.bf16.msra.mxu1 %v1878_v50 }
 0x258   :  { %1151 = vmatprep.subr.bf16.mxu1 %v1883_v51 }
 0x25b   :  { %1152 = vmatpush1.bf16.msra.mxu1 %v1881_v52 }
 0x25c   :  { %1153 = vmatprep.subr.bf16.mxu1 %v1886_v54 }
 0x25f   :  { %1154 = vmatpush1.bf16.msra.mxu1 %v1884_v55 }
 0x260   :  { %1155 = vmatprep.subr.bf16.mxu1 %v1889_v57 }
 0x263   :  { %1156 = vmatpush1.bf16.msra.mxu1 %v1887_v58 }
 0x264   :  { %1157 = vmatprep.subr.bf16.mxu1 %v1892_v60 }
 0x267   :  { %1158 = vmatpush1.bf16.msra.mxu1 %v1890_v61 }
 0x26a   :  { %1160 = vmatmul.mubr.bf16.vlgmr.msra.gmra.mrb[4].mxu1 %v688_v7 }
 0x33d   :  { %v1161_v9 = vpop.f32.mrb[4].mxu1 }
 0x33e   :  { %v1677_v11 = vadd.f32 %v1161_v9, %v759_v5  ;;  %v1163_v12 = vpop.f32.mrb[5].mxu1 }
 0x33f   :  { %v1678_v13 = vadd.f32 %v1163_v12, %v763_v6  ;;  %v1165_v14 = vpop.f32.mrb[6].mxu1 }
 0x340   :  { %v1168_v15 = vmax.f32 %v1677_v11, 0.0  ;;  %v1166_v16 = vpop.f32.mrb[7].mxu1 }
 0x341   :  { %v1169_v17 = vmax.f32 %v1678_v13, 0.0 }
 0x342   :  { %v1170_v20 = vpack.c.bf16 %v1168_v15, %v1168_v15 }
 0x343   :  { %v1171_v18 = vpack.c.bf16 %v1169_v17, %v1169_v17 }
 0x345   :  { %1339 = vmatprep.mubr.bf16.mxu0 %v1171_v18 }
 0x346   :  { %1340 = vmatmul.mubr.bf16.vlgmr.msra.gmra.mrb[8].mxu0 %v1170_v20 }
 0x347   :  { %1658 = vmatpush3.bf16.msra.mxu0 %v1909_v19  ;;  %1673 = vmatprep.mubr.msk.bf16.mxu0 %vm2071_vm1, %v2070_v3 }
 0x348   :  { %1659 = vmatprep.subr.bf16.mxu0 %v2070_v3 }
 0x34b   :  { %1660 = vmatpush3.bf16.msra.mxu0 %v1910_v21 }
 0x34c   :  { %1661 = vmatprep.subr.bf16.mxu0 %v2070_v3 }
 0x34f   :  { %1662 = vmatpush3.bf16.msra.mxu0 %v1911_v8 }
 0x350   :  { %1663 = vmatprep.subr.bf16.mxu0 %v2070_v3 }
 0x353   :  { %1664 = vmatpush3.bf16.msra.mxu0 %v1912_v10 }
 0x354   :  { %1665 = vmatprep.subr.bf16.mxu0 %v2070_v3 }
 0x357   :  { %1666 = vmatpush3.bf16.msra.mxu0 %v1913_v22 }
 0x358   :  { %1667 = vmatprep.subr.bf16.mxu0 %v2070_v3 }
 0x35b   :  { %1668 = vmatpush3.bf16.msra.mxu0 %v1914_v23 }
 0x35c   :  { %1669 = vmatprep.subr.bf16.mxu0 %v2070_v3 }
 0x35f   :  { %1670 = vmatpush3.bf16.msra.mxu0 %v1915_v24 }
 0x360   :  { %1671 = vmatprep.subr.bf16.mxu0 %v2070_v3 }
 0x363   :  { %1672 = vmatpush3.bf16.msra.mxu0 %v1916_v25 }
 0x419   :  { %v1642_v26 = vpop.f32.mrb[8].mxu0 }
 0x41a   :  { %v1643_v28 = vpop.f32.mrb[9].mxu0 }
 0x41b   :  { %v1644_v29 = vadd.f32 %v1643_v28, %v1642_v26  ;;  %v1645_v30 = vpop.f32.mrb[10].mxu0 }
 0x41c   :  { %v1646_v31 = vpop.f32.mrb[11].mxu0 }
 0x41d   :  { %v1342_v32 = vadd.f32 %v1644_v29, %v1600_v27 }
 0x41f   :  { %v1347_v33 = vmax.f32 %v1342_v32, 0.0 }
 0x421   :  { %v1348_v34 = vpack.c.bf16 %v1347_v33, %v1347_v33 }
 0x423   :  { %1674 = vmatmul.mubr.bf16.vlgmr.msra.gmra.mrb[12].mxu0 %v1348_v34 }
 0x4f6   :  { %v1454_v36 = vpop.f32.mrb[12].mxu0 }
 0x4f7   :  { %v1455_v37 = vadd.f32 %v1617_v35, %v1454_v36  ;;  %v1675_v38 = vpop.f32.mrb[13].mxu0 }
 0x4f8   :  { %v1457_v39 = vpop.f32.mrb[14].mxu0 }
 0x4f9   :  { %1460 = vst [vmem:[%s2258_s11] sm:$0xff] %v1455_v37  ;;  %v1676_v40 = vpop.f32.mrb[15].mxu0 }
 0x4fa   :  { %1465 = vsyncpa [#allocation3], 1 }
 0x4fb   :  { %1466 = vsyncpa [#allocation5], 1 }
 0x4fc   :  { %1467 = vsyncpa [#allocation8], 1 }
 0x4fd   :  { %1468 = vsyncpa [#allocation11], 1 }

</bundles_post_ra>
